<compile_context>
chip_gen: v7x
topology: tpu7x:2x2x1
jax: 0.10.0
libtpu: 0.0.40
codegen_flags: <defaults>
</compile_context>

<pallas_src>
import functools

import jax
import jax.numpy as jnp
from jax.experimental import pallas as pl
from jax.experimental.pallas import tpu as pltpu


def _round_up(a, m):
    return (a + m - 1) // m * m


def _cdiv(a, m):
    return (a + m - 1) // m


def _choose_batch_block(N, C, F_out, batch_block):
    """Largest divisor of N (<= batch_block) whose folded sublane dims are aligned.

    Bn divides N  -> no host-side batch padding.
    (Bn*C) % 8 == 0 (or Bn == N) -> full-sublane input blocks (same for Bn*F).
    Prefer >= 2 batch blocks so both v7x TensorCores get work.
    """
    # TODO(synk): when N == 1 on v7x, split the time axis into two overlapping halves
    # (L-sample halo) presented as two batch entries so the second core is not idle.
    divs = [d for d in range(1, N + 1) if N % d == 0]

    def aligned(d):
        return (((d * C) % 8 == 0) or d == N) and (((d * F_out) % 8 == 0) or d == N)

    c1 = [d for d in divs if aligned(d) and d <= batch_block and N // d >= 2]
    if c1:
        return max(c1)
    c2 = [d for d in divs if aligned(d) and d <= batch_block]
    if c2:
        return max(c2)
    c3 = [d for d in divs if aligned(d)]   # d == N is always aligned -> never empty
    return min(c3)


def _block_diag(w, Bn):
    """(F, C) -> block-diagonal (Bn*F, Bn*C): one dot handles Bn batch items."""
    F_, C_ = w.shape
    eye = jnp.eye(Bn, dtype=w.dtype)
    return jnp.einsum('ij,fc->ifjc', eye, w).reshape(Bn * F_, Bn * C_)


def _comb_filter_kernel(x_ref, w0_ref, w1_ref, y_ref, hist_ref, *, L, L_pad, carry_halo):
    # x_ref:    (Bn*C, Tt)          current input slab (batch folded into sublanes)
    # w0_ref:   (Bn*F, Bn*C)        block-diagonal delayed-tap weight (pairs with x[t-L])
    # w1_ref:   (Bn*F, Bn*C)        block-diagonal current-tap weight (pairs with x[t])
    # y_ref:    (Bn*F, Tt)          output slab
    # hist_ref: (Bn*C, L_pad + Tt)  scratch: [halo of previous tile | current tile]
    Tt = x_ref.shape[-1]

    @pl.when(pl.program_id(1) == 0)
    def _():
        # Implicit left zero-padding F.pad(x, (L, 0)) for the first tile of each batch
        # block; only the halo columns are cleared (the tile region is overwritten below).
        hist_ref[:, pl.ds(0, L_pad)] = jnp.zeros(
            (hist_ref.shape[0], L_pad), hist_ref.dtype)

    x = x_ref[...]
    hist_ref[:, pl.ds(L_pad, Tt)] = x              # stage current tile once (lane-aligned)
    xs = hist_ref[:, pl.ds(L_pad - L, Tt)]         # delayed tap x[:, t - L], halo-correct

    y = (jnp.dot(w0_ref[...], xs, preferred_element_type=jnp.float32)
         + jnp.dot(w1_ref[...], x, preferred_element_type=jnp.float32))
    y_ref[...] = y.astype(y_ref.dtype)

    if carry_halo:  # static: emitted only when there is more than one time tile
        # Carry the tail of this tile into the halo region (lane-aligned, width
        # L_pad >= L).  Must remain AFTER the delayed-window read above.
        hist_ref[:, pl.ds(0, L_pad)] = x[:, Tt - L_pad:]


def comb_filter(x, weight, L, *, batch_block=8, time_tile=16384):
    """x: (N, C, T) f32; weight: (F, C, 2) f32 (PyTorch Conv1d layout); L: static int >= 1."""
    N, C, T = x.shape
    F_out = weight.shape[0]
    assert weight.shape == (F_out, C, 2)
    assert L >= 1

    Bn = _choose_batch_block(N, C, F_out, batch_block)
    nb = N // Bn
    L_pad = _round_up(L, 128)

    # --- time-tile selection --------------------------------------------------
    # VMEM-aware target: 2x input buffer + 2x output buffer + history scratch under
    # ~24 MiB (comfortable on v7x's 64 MiB VMEM; explicit limit below covers v5e).
    bytes_per_col = 4 * Bn * (3 * C + 2 * F_out)
    budget = max(128 * bytes_per_col, (24 << 20) - 4 * Bn * C * L_pad)
    tt_budget = max(128, (budget // bytes_per_col) // 128 * 128)
    target_tt = max(128, min(_round_up(time_tile, 128), tt_budget))

    m = _cdiv(T, 128)
    T128 = m * 128
    divs_m = [d for d in range(1, m + 1) if m % d == 0]
    ok = [d for d in divs_m if d * 128 >= L or d == m]       # halo must fit in one tile
    small = [d for d in ok if d * 128 <= target_tt]
    d = max(small) if small else min(ok)
    if d * 128 >= min(target_tt, T128) // 4:
        # Tile divides the 128-padded length: at most 127 padded columns, often zero.
        Tt, T_pad = d * 128, T128
    else:
        # Degenerate divisors (e.g. prime-length sequences): accept extra padding
        # rather than tiny, overhead-dominated tiles.
        Tt = max(target_tt, L_pad)
        if Tt >= T128:
            Tt = T128
        T_pad = _round_up(T, Tt)
    nt = T_pad // Tt

    # --- host-side layout (free reshapes; pad/slice only when actually needed) ---
    w0_bd = _block_diag(weight[:, :, 0], Bn)   # tap at t - L
    w1_bd = _block_diag(weight[:, :, 1], Bn)   # tap at t

    x2 = x.reshape(N * C, T)
    if T_pad != T:
        x2 = jnp.pad(x2, ((0, 0), (0, T_pad - T)))

    kernel = functools.partial(_comb_filter_kernel, L=L, L_pad=L_pad, carry_halo=nt > 1)
    y2 = pl.pallas_call(
        kernel,
        out_shape=jax.ShapeDtypeStruct((N * F_out, T_pad), x.dtype),
        grid_spec=pltpu.PrefetchScalarGridSpec(
            num_scalar_prefetch=0,
            grid=(nb, nt),
            in_specs=[
                pl.BlockSpec((Bn * C, Tt), lambda i, j: (i, j)),
                pl.BlockSpec((Bn * F_out, Bn * C), lambda i, j: (0, 0)),
                pl.BlockSpec((Bn * F_out, Bn * C), lambda i, j: (0, 0)),
            ],
            out_specs=pl.BlockSpec((Bn * F_out, Tt), lambda i, j: (i, j)),
            scratch_shapes=[pltpu.VMEM((Bn * C, L_pad + Tt), x.dtype)],
        ),
        compiler_params=pltpu.CompilerParams(
            dimension_semantics=("parallel", "arbitrary"),
            vmem_limit_bytes=48 << 20),
        cost_estimate=pl.CostEstimate(
            flops=4 * N * F_out * C * T_pad,
            transcendentals=0,
            bytes_accessed=4 * (N * C * T_pad + N * F_out * T_pad
                                + 2 * Bn * F_out * Bn * C)),
    )(x2, w0_bd, w1_bd)

    y = y2.reshape(N, F_out, T_pad)
    if T_pad != T:
        y = y[:, :, :T]
    return y


def comb_filter_reference(x, weight, L):
    """Pure-JAX reference of the PyTorch forward (left zero-pad + dilated 2-tap conv)."""
    N, C, T = x.shape
    x_p = jnp.pad(x, ((0, 0), (0, 0), (L, 0)))          # (N, C, T+L)
    w0 = weight[:, :, 0]
    w1 = weight[:, :, 1]
    return (jnp.einsum('fc,nct->nft', w0, x_p[:, :, :T])
            + jnp.einsum('fc,nct->nft', w1, x_p[:, :, L:L + T]))


def _make_weight(key, ninputs, fmaps):
    # Mirror CombFilter.__init__: weight[:, :, 1] = 1.0, weight[:, :, 0] ~ U(0, 1).
    w_col0 = jax.random.uniform(key, (fmaps * ninputs,), dtype=jnp.float32)
    return jnp.stack([w_col0, jnp.ones_like(w_col0)], axis=-1).reshape(fmaps, ninputs, 2)


if __name__ == "__main__":
    key = jax.random.PRNGKey(0)
    kx, kw, kx2, kw2, kx3, kw3 = jax.random.split(key, 6)

    ninputs, fmaps = 4, 8

    # 1) Small shapes consistent with the module (single time tile).
    N, T, L = 2, 32, 4
    weight = _make_weight(kw, ninputs, fmaps)
    x = jax.random.normal(kx, (N, ninputs, T), dtype=jnp.float32)
    y = jax.block_until_ready(comb_filter(x, weight, L))
    y_ref = comb_filter_reference(x, weight, L)
    assert y.shape == (N, fmaps, T)
    assert jnp.allclose(y, y_ref, atol=1e-5, rtol=1e-5), "mismatch (single tile)"

    # 2) Multiple time tiles (halo carry), odd batch (block == full batch), T padding.
    N2, T2, L2 = 3, 300, 7
    weight2 = _make_weight(kw2, ninputs, fmaps)
    x2 = jax.random.normal(kx2, (N2, ninputs, T2), dtype=jnp.float32)
    y2 = jax.block_until_ready(comb_filter(x2, weight2, L2, batch_block=2, time_tile=128))
    y2_ref = comb_filter_reference(x2, weight2, L2)
    assert y2.shape == (N2, fmaps, T2)
    assert jnp.allclose(y2, y2_ref, atol=1e-5, rtol=1e-5), "mismatch (tiled time)"

    # 3) Multiple batch blocks + multiple time tiles with zero padding / zero slicing
    #    (T is a multiple of the chosen tile; Bn divides N).
    N3, T3, L3 = 4, 384, 5
    weight3 = _make_weight(kw3, ninputs, fmaps)
    x3 = jax.random.normal(kx3, (N3, ninputs, T3), dtype=jnp.float32)
    y3 = jax.block_until_ready(comb_filter(x3, weight3, L3, time_tile=128))
    y3_ref = comb_filter_reference(x3, weight3, L3)
    assert y3.shape == (N3, fmaps, T3)
    assert jnp.allclose(y3, y3_ref, atol=1e-5, rtol=1e-5), "mismatch (batch blocks)"

    print("KERNEL_OK")
</pallas_src>

<mosaic_0001>
module attributes {stable_mosaic.version = 11 : i64} {
  func.func @_comb_filter_kernel(%arg0: i32, %arg1: i32, %arg2: memref<8x128xf32, #tpu.memory_space<vmem>>, %arg3: memref<16x8xf32, #tpu.memory_space<vmem>>, %arg4: memref<16x8xf32, #tpu.memory_space<vmem>>, %arg5: memref<16x128xf32, #tpu.memory_space<vmem>>, %arg6: memref<8x256xf32, #tpu.memory_space<vmem>>) attributes {dimension_semantics = [#tpu.dimension_semantics<parallel>, #tpu.dimension_semantics<arbitrary>], iteration_bounds = array<i64: 1, 1>, scalar_prefetch = 0 : i64, scratch_operands = 1 : i64, tpu.core_type = #tpu.core_type<tc>, window_params = [{transform_indices = @transform_0, window_bounds = array<i64: 8, 128>}, {pipeline_mode = #tpu.pipeline_mode<synchronous>, transform_indices = @transform_1, window_bounds = array<i64: 16, 8>}, {pipeline_mode = #tpu.pipeline_mode<synchronous>, transform_indices = @transform_2, window_bounds = array<i64: 16, 8>}, {transform_indices = @transform_3, window_bounds = array<i64: 16, 128>}]} {
    %c0_i32 = arith.constant 0 : i32
    %0 = arith.cmpi eq, %arg1, %c0_i32 : i32
    %1 = arith.extui %0 : i1 to i32
    %c0_i32_0 = arith.constant 0 : i32
    %2 = arith.cmpi ne, %1, %c0_i32_0 : i32
    scf.if %2 {
      %cst_11 = arith.constant 0.000000e+00 : f32
      %12 = vector.broadcast %cst_11 : f32 to vector<8x128xf32>
      %c0_12 = arith.constant 0 : index
      %c0_13 = arith.constant 0 : index
      %13 = vector.load %arg6[%c0_12, %c0_13] : memref<8x256xf32, #tpu.memory_space<vmem>>, vector<8x128xf32>
      tpu.vector_store %arg6[%c0_12, %c0_13], %12 {strides = array<i32>} : memref<8x256xf32, #tpu.memory_space<vmem>>, vector<8x128xf32>,
    } else {
    }
    %c0 = arith.constant 0 : index
    %c0_1 = arith.constant 0 : index
    %3 = vector.load %arg2[%c0, %c0_1] : memref<8x128xf32, #tpu.memory_space<vmem>>, vector<8x128xf32>
    %c0_2 = arith.constant 0 : index
    %c128 = arith.constant 128 : index
    %4 = vector.load %arg6[%c0_2, %c128] : memref<8x256xf32, #tpu.memory_space<vmem>>, vector<8x128xf32>
    tpu.vector_store %arg6[%c0_2, %c128], %3 {strides = array<i32>} : memref<8x256xf32, #tpu.memory_space<vmem>>, vector<8x128xf32>,
    %c0_3 = arith.constant 0 : index
    %c124 = arith.constant 124 : index
    %5 = vector.load %arg6[%c0_3, %c124] : memref<8x256xf32, #tpu.memory_space<vmem>>, vector<8x128xf32>
    %c0_4 = arith.constant 0 : index
    %c0_5 = arith.constant 0 : index
    %6 = vector.load %arg3[%c0_4, %c0_5] : memref<16x8xf32, #tpu.memory_space<vmem>>, vector<16x8xf32>
    %cst = arith.constant dense<0.000000e+00> : vector<16x128xf32>
    %7 = tpu.matmul %6, %5, %cst {dimension_numbers = #tpu.dot_dimension_numbers<[1], [0], [0], [1], [0, 0, 1, 1], [], []>} : vector<16x8xf32>, vector<8x128xf32>, vector<16x128xf32> -> vector<16x128xf32>
    %c0_6 = arith.constant 0 : index
    %c0_7 = arith.constant 0 : index
    %8 = vector.load %arg4[%c0_6, %c0_7] : memref<16x8xf32, #tpu.memory_space<vmem>>, vector<16x8xf32>
    %cst_8 = arith.constant dense<0.000000e+00> : vector<16x128xf32>
    %9 = tpu.matmul %8, %3, %cst_8 {dimension_numbers = #tpu.dot_dimension_numbers<[1], [0], [0], [1], [0, 0, 1, 1], [], []>} : vector<16x8xf32>, vector<8x128xf32>, vector<16x128xf32> -> vector<16x128xf32>
    %10 = arith.addf %7, %9 : vector<16x128xf32>
    %c0_9 = arith.constant 0 : index
    %c0_10 = arith.constant 0 : index
    %11 = vector.load %arg5[%c0_9, %c0_10] : memref<16x128xf32, #tpu.memory_space<vmem>>, vector<16x128xf32>
    tpu.vector_store %arg5[%c0_9, %c0_10], %10 {strides = array<i32>} : memref<16x128xf32, #tpu.memory_space<vmem>>, vector<16x128xf32>,
    return
  }
  func.func @transform_0(%arg0: i32, %arg1: i32) -> (i32, i32) {
    %c0_i32 = arith.constant 0 : i32
    return %arg0, %arg1 : i32, i32
  }
  func.func @transform_1(%arg0: i32, %arg1: i32) -> (i32, i32) {
    %c0_i32 = arith.constant 0 : i32
    %c0_i32_0 = arith.constant 0 : i32
    %c0_i32_1 = arith.constant 0 : i32
    return %c0_i32, %c0_i32_0 : i32, i32
  }
  func.func @transform_2(%arg0: i32, %arg1: i32) -> (i32, i32) {
    %c0_i32 = arith.constant 0 : i32
    %c0_i32_0 = arith.constant 0 : i32
    %c0_i32_1 = arith.constant 0 : i32
    return %c0_i32, %c0_i32_0 : i32, i32
  }
  func.func @transform_3(%arg0: i32, %arg1: i32) -> (i32, i32) {
    %c0_i32 = arith.constant 0 : i32
    return %arg0, %arg1 : i32, i32
  }
}

</mosaic_0001>

<bundles_post_ra>
// kernel: tpu_custom_call.1
= control target key start
LH: loop header
LB: loop body
LE: loop exit
PB: predicated region body
PF: predicated region fallthrough
CT: control target
= control target key end

     0   :  { %vm28_vm0 = vcmask 64512   ;;  %v269_v2 = vmov 0.0   ;;  %s270_s16 = smov 4   ;;  %s325_s0 = inlined_call_operand.vmem [shape: f32[8,128], index: 0, kind: input, shape index: {}]   ;;  %s326_s1 = inlined_call_operand.vmem [shape: f32[16,8], index: 1, kind: input, shape index: {}]   ;;  %s327_s2 = inlined_call_operand.vmem [shape: f32[16,8], index: 2, kind: input, shape index: {}]   ;;  %s328_s3 = inlined_call_operand.hbm [shape: f32[16,128], index: 3, kind: output, shape index: {}]  }
   0x1   :  { %v20_v0 = vld [vmem:[%s325_s0] sm:$0xff]  ;;  %112 = vrot.lane.b32.xlu0 %v269_v2, %s270_s16  ;;  %v27_v3 = vld [vmem:[%s327_s2 + $0x8] sm:$0xff] }
   0x2   :  { %v26_v1 = vld [vmem:[%s327_s2] sm:$0xff]  ;;  %228 = vmatprep.subr.mxu1 %v20_v0 }
   0x3   :  { %v24_v4 = vld [vmem:[%s326_s1] sm:$0xff]  ;;  %229 = vmatpush3.msra.mxu1 %v20_v0  ;;  %230 = vmatprep.mubr.msk.f32.mxu1 %vm28_vm0, %v26_v1 }
   0x4   :  { %8 = vsyncpa [#allocation4], 0  ;;  %231 = vmatmul.mubr.msk.f32.vlgmr.msra.gmra.mrb[0].mxu1 %vm28_vm0, %v27_v3  ;;  %235 = vmatprep.mubr.msk.f32.mxu0 %vm28_vm0, %v24_v4  ;;  %vm116_vm1 = vcmask 31744   ;;  %v25_v8 = vld [vmem:[%s326_s1 + $0x8] sm:$0xff]  ;;  %s271_s2 = smov [#allocation3]  }
   0x5   :  { %114 = vrot.lane.b32.xlu0 %v20_v0, %s270_s16  ;;  %s207_s22 = sshll.u32 %s271_s2, 4  ;;  %s208_s22 = int_to_ptr.vmem [resolvable:$true] %s207_s22 }
   0x6   :  { %s245_s23 = scalar_lea.vmem %s208_s22, 256  ;;  %p250_p1 = scmp.lt.s32.totalorder %s208_s22, %s208_s22 }
   0x7   :  { %p246_p0 = scmp.ne.s32.totalorder %s208_s22, %s245_s23  ;;  %p251_p2 = scmp.lt.s32.totalorder %s245_s23, %s245_s23 }
   0x9   :  { %p252_p3 = por %p251_p2, %p250_p1 }
   0xb   :  { %p253_p4 = pnand %p252_p3, %p246_p0 }
  0x73   :  { %v113_v5 = vpop.permute.xlu0 %112 }
  0x77   :  { %v115_v6 = vpop.permute.xlu0 %114 }
  0x78   :  { %v117_v7 = vsel %vm116_vm1, %v113_v5, %v115_v6 }
  0x79   :  { %233 = vmatprep.subr.mxu0 %v117_v7 }
  0x7a   :  { %234 = vmatpush3.msra.mxu0 %v117_v7 }
  0x7b   :  { %236 = vmatmul.mubr.msk.f32.vlgmr.msra.gmra.mrb[0].mxu0 %vm28_vm0, %v25_v8 }
  0xd7   :  { %v232_v9 = vpop.f32.mrb[0].mxu1 }
  0xd8   :  { %v101_v10 = vpop.f32.mrb[1].mxu1 }
 0x14e   :  { %v237_v11 = vpop.f32.mrb[0].mxu0 }
 0x14f   :  { %v197_v12 = vadd.f32 %v237_v11, %v232_v9  ;;  %v191_v13 = vpop.f32.mrb[1].mxu0 }
 0x150   :  { %v192_v14 = vadd.f32 %v191_v13, %v101_v10 }
 0x151   :  { %201 = vst [vmem:[#allocation3 + $0x8] sm:$0xff] %v197_v12 }
 0x152   :  { %200 = vst [vmem:[#allocation3] sm:$0xff] %v192_v14 }
 0x153   :  { %256 = shalt.err (!%p253_p4)
}
 0x154   :  { %s257_s25 = scalar_lea.hbm %s328_s3, 256 }
 0x155   :  { %p258_p5 = scmp.ne.s32.totalorder %s328_s3, %s257_s25  ;;  %p261_p6 = scmp.lt.u32.totalorder %s257_s25, %s328_s3 }
 0x157   :  { %p263_p7 = pnand %p261_p6, %p258_p5 }
 0x159   :  { %266 = shalt.err (!%p263_p7)
}
 0x15a   :  { %s272_s30 = smov 128   ;;  %s273_s4 = smov 8  }
 0x15b   :  { %213 = dma.vmem_to_hbm [thread:$0]  %s208_s22, 256, %s328_s3, [#allocation4], %s272_s30, %s272_s30, %s273_s4  }
 0x15c   :  { %267 = dma.done.wait [#allocation4], 256  }
 0x15d   :  { %268 = vsyncadd [#allocation4], 4294967040 }
 0x15e   :  { %217 = vsyncpa [#allocation4], 1 }

</bundles_post_ra>
